<compile_context>
chip_gen: v5e
topology: v5e:2x2
jax: 0.10.0
libtpu: 0.0.40
codegen_flags: <defaults>
</compile_context>

<pallas_src>
import functools

import jax
import jax.numpy as jnp
from jax.experimental import pallas as pl
from jax.experimental.pallas import tpu as pltpu

# Keep f32 matmul precision on the MXU so kernel and reference agree tightly.
jax.config.update("jax_default_matmul_precision", "highest")

LANES = 128        # packed layer-2 width / output lane width
NEG_BIG = -1e30    # softmax suppression for non-actor lanes (exp underflows to 0)


def _round_up(n, m):
    return ((n + m - 1) // m) * m


def _slot_width(payload_lanes):
    """Smallest divisor of 128 (>= 16) holding `payload_lanes` values."""
    for s in (16, 32, 64, 128):
        if payload_lanes <= s:
            return s
    raise ValueError("actor logits + value must fit in 128 lanes")


# --------------------------------------------------------------------------
# Kernel
# --------------------------------------------------------------------------
def actor_critic_kernel(x_ref, w1_ref, b1_ref, w2_ref, b2_ref, mask_ref, out_ref,
                        *, rows_per_out, slot):
    x = x_ref[...]                                                   # (TB, in_dim)

    # Fused layer 1 (critic | actor | zero pad) -> (TB, 128): one MXU dot.
    h1 = jnp.dot(x, w1_ref[...], preferred_element_type=jnp.float32) + b1_ref[...]
    h1 = jnp.maximum(h1, 0.0)

    # Fused layer 2 (block-diagonal heads, padded to 128 lanes): one MXU dot.
    #   lanes [0, out_dim)  -> actor logits
    #   lane  out_dim       -> critic value
    #   lanes (out_dim,128) -> zero padding
    z = jnp.dot(h1, w2_ref[...], preferred_element_type=jnp.float32) + b2_ref[...]

    # Resident masks (built once at pack time; no per-step iota/compare):
    #   mask row 0: 0 on actor lanes, -1e30 elsewhere  (softmax suppression)
    #   mask row 1: 1 on the value lane, 0 elsewhere   (value selector)
    zm = z + mask_ref[0:1, :]
    m = jnp.max(zm, axis=1, keepdims=True)
    e = jnp.exp(zm - m)                     # non-actor lanes underflow to exactly 0
    denom = jnp.sum(e, axis=1, keepdims=True)
    probs = e / denom                       # exact division: probs sum to 1 in f32
    packed = probs + z * mask_ref[1:2, :]   # (TB, 128): probs | value | zeros

    # Lane-dense, padding-free writeback: pack `rows_per_out` batch rows per
    # 128-lane output row (each row occupies a `slot`-lane segment).  Uses only
    # static sublane slices + a lane-dim concatenate; single unmasked store.
    tb = packed.shape[0]
    n = tb // rows_per_out
    parts = [packed[j * n:(j + 1) * n, :slot] for j in range(rows_per_out)]
    out_ref[...] = jnp.concatenate(parts, axis=1).astype(out_ref.dtype)


# --------------------------------------------------------------------------
# Wrapper
# --------------------------------------------------------------------------
def actor_critic_forward(x, packed_params, output_dim, *, tile_b=None):
    """Fused actor-critic forward.

    x: [B, input_dim] float32
    packed_params: output of pack_params().
    Returns (probs [B, output_dim], value [B, 1]).
    """
    w1, b1, w2, b2, masks = packed_params
    B, input_dim = x.shape
    payload = output_dim + 1
    assert payload <= LANES
    slot = _slot_width(payload)          # lanes per batch row in the packed output
    rows_per_out = LANES // slot         # batch rows packed per 128-lane output row
    granule = 8 * rows_per_out           # batch-tile granularity (sublane-aligned)

    if tile_b is None:
        # Biggest batch tile that fits the streamed-VMEM budget.  The x block is
        # lane-padded to 128 in VMEM; x and out blocks are double-buffered.
        # Budget sized for v7x's 64 MiB per-TC VMEM (48 MiB scoped limit below).
        budget = 40 * 1024 * 1024
        lane_padded_in = max(LANES, _round_up(input_dim, LANES))
        stream_bytes_per_row = 2 * 4 * lane_padded_in + 2 * 4 * slot
        weight_bytes = 2 * 4 * (w1.size + b1.size + w2.size + b2.size + masks.size)
        max_tile = max(granule,
                       ((budget - weight_bytes) // stream_bytes_per_row)
                       // granule * granule)
        tile_b = min(8192, max_tile, _round_up(B, granule))
        # v7x megacore: keep >= 2 grid steps (sharded over the 2 TensorCores by
        # dimension_semantics) whenever there is enough batch to split.
        if B > granule:
            tile_b = min(tile_b, max(granule, _round_up(pl.cdiv(B, 2), granule)))
    tile_b = _round_up(max(tile_b, granule), granule)

    padded_b = _round_up(B, tile_b)
    if padded_b != B:
        x = jnp.pad(x, ((0, padded_b - B), (0, 0)))
    num_steps = padded_b // tile_b
    out_rows_per_step = tile_b // rows_per_out

    const = lambda i: (0, 0)   # resident weights/masks: same block every grid step

    out = pl.pallas_call(
        functools.partial(actor_critic_kernel, rows_per_out=rows_per_out, slot=slot),
        out_shape=jax.ShapeDtypeStruct((padded_b // rows_per_out, LANES), jnp.float32),
        grid=(num_steps,),
        in_specs=[
            pl.BlockSpec((tile_b, input_dim), lambda i: (i, 0)),   # streamed x tile
            pl.BlockSpec(w1.shape, const),                         # W1    (resident)
            pl.BlockSpec(b1.shape, const),                         # b1    (resident)
            pl.BlockSpec(w2.shape, const),                         # W2    (resident)
            pl.BlockSpec(b2.shape, const),                         # b2    (resident)
            pl.BlockSpec(masks.shape, const),                      # masks (resident)
        ],
        out_specs=pl.BlockSpec((out_rows_per_step, LANES), lambda i: (i, 0)),
        compiler_params=pltpu.CompilerParams(
            dimension_semantics=("parallel",),      # megacore sharding on v7x
            vmem_limit_bytes=48 * 1024 * 1024,      # <= v7x 64 MiB physical VMEM
        ),
    )(x, w1, b1, w2, b2, masks)

    # Un-pack: grid step i stores batch row i*tile_b + j*n + r at output row
    # i*n + r, lanes [j*slot, (j+1)*slot), with n = tile_b // rows_per_out.
    n = out_rows_per_step
    rows = (out.reshape(num_steps, n, rows_per_out, slot)
               .transpose(0, 2, 1, 3)
               .reshape(padded_b, slot))
    probs = rows[:B, :output_dim]
    value = rows[:B, output_dim:output_dim + 1]
    return probs, value


# --------------------------------------------------------------------------
# Params: init (PyTorch nn.Linear-style) and one-time fused packing
# --------------------------------------------------------------------------
def init_params(key, input_dim, output_dim, hidden_dim):
    """nn.Linear default init (U(+/- 1/sqrt(fan_in))); weights stored [in, out]."""
    keys = jax.random.split(key, 8)

    def lin(kw, kb, fan_in, fan_out):
        bound = 1.0 / jnp.sqrt(jnp.float32(fan_in))
        w = jax.random.uniform(kw, (fan_in, fan_out), jnp.float32, -bound, bound)
        b = jax.random.uniform(kb, (1, fan_out), jnp.float32, -bound, bound)
        return w, b

    wc1, bc1 = lin(keys[0], keys[1], input_dim, hidden_dim)
    wc2, bc2 = lin(keys[2], keys[3], hidden_dim, 1)
    wa1, ba1 = lin(keys[4], keys[5], input_dim, hidden_dim)
    wa2, ba2 = lin(keys[6], keys[7], hidden_dim, output_dim)
    return dict(wc1=wc1, bc1=bc1, wc2=wc2, bc2=bc2,
                wa1=wa1, ba1=ba1, wa2=wa2, ba2=ba2)


def pack_params(params, output_dim):
    """One-time packing of actor+critic into the fused kernel layout."""
    input_dim, hidden = params["wc1"].shape
    h2p = max(LANES, _round_up(2 * hidden, LANES))   # lane-dense layer-1 width

    # Layer 1: [in, h2p] = [critic H | actor H | zero pad].
    w1 = jnp.zeros((input_dim, h2p), jnp.float32)
    w1 = w1.at[:, :hidden].set(params["wc1"])
    w1 = w1.at[:, hidden:2 * hidden].set(params["wa1"])
    b1 = jnp.zeros((1, h2p), jnp.float32)
    b1 = b1.at[:, :hidden].set(params["bc1"])
    b1 = b1.at[:, hidden:2 * hidden].set(params["ba1"])

    # Layer 2: block-diagonal [h2p, 128]:
    #   rows 0..H-1  (critic hidden) -> output lane `output_dim` (value)
    #   rows H..2H-1 (actor hidden)  -> output lanes [0, output_dim) (logits)
    w2 = jnp.zeros((h2p, LANES), jnp.float32)
    w2 = w2.at[:hidden, output_dim:output_dim + 1].set(params["wc2"])
    w2 = w2.at[hidden:2 * hidden, :output_dim].set(params["wa2"])
    b2 = jnp.zeros((1, LANES), jnp.float32)
    b2 = b2.at[:, output_dim:output_dim + 1].set(params["bc2"])
    b2 = b2.at[:, :output_dim].set(params["ba2"])

    # Resident per-lane masks (hoists per-step iota/compare out of the kernel).
    lane = jnp.arange(LANES)
    softmax_mask = jnp.where(lane < output_dim, 0.0, NEG_BIG).astype(jnp.float32)
    value_sel = jnp.where(lane == output_dim, 1.0, 0.0).astype(jnp.float32)
    masks = jnp.stack([softmax_mask, value_sel], axis=0)             # (2, 128)
    return w1, b1, w2, b2, masks


def reference_forward(x, params):
    hc = jnp.maximum(x @ params["wc1"] + params["bc1"], 0.0)
    value = hc @ params["wc2"] + params["bc2"]
    ha = jnp.maximum(x @ params["wa1"] + params["ba1"], 0.0)
    logits = ha @ params["wa2"] + params["ba2"]
    probs = jax.nn.softmax(logits, axis=1)
    return probs, value


# --------------------------------------------------------------------------
# Main
# --------------------------------------------------------------------------
if __name__ == "__main__":
    # Small shapes consistent with the module: x is [batch, input_dim].
    batch, input_dim, output_dim, hidden_dim = 8, 16, 4, 32

    key = jax.random.PRNGKey(0)
    kx, kp = jax.random.split(key)
    x = jax.random.normal(kx, (batch, input_dim), jnp.float32)
    params = init_params(kp, input_dim, output_dim, hidden_dim)
    packed = pack_params(params, output_dim)

    probs, value = jax.block_until_ready(
        actor_critic_forward(x, packed, output_dim))

    assert probs.shape == (batch, output_dim)
    assert value.shape == (batch, 1)
    # Exact softmax normalization (no approximate reciprocal).
    assert jnp.allclose(jnp.sum(probs, axis=1), 1.0, atol=1e-5)

    ref_probs, ref_value = reference_forward(x, params)
    assert jnp.allclose(probs, ref_probs, atol=2e-3)
    assert jnp.allclose(value, ref_value, atol=2e-3)

    # Exercise multi-step grid + batch padding + the row-packed writeback path.
    x2 = jax.random.normal(jax.random.PRNGKey(1), (200, input_dim), jnp.float32)
    p2, v2 = jax.block_until_ready(
        actor_critic_forward(x2, packed, output_dim, tile_b=64))
    rp2, rv2 = reference_forward(x2, params)
    assert p2.shape == (200, output_dim) and v2.shape == (200, 1)
    assert jnp.allclose(jnp.sum(p2, axis=1), 1.0, atol=1e-5)
    assert jnp.allclose(p2, rp2, atol=2e-3)
    assert jnp.allclose(v2, rv2, atol=2e-3)

    # TODO(synk): torch's forward returns (Categorical(probs), value); a
    # distribution object has no kernel equivalent, so `probs` is returned.
    print("KERNEL_OK")
</pallas_src>

<mosaic_0001>
module attributes {stable_mosaic.version = 11 : i64} {
  func.func @actor_critic_kernel(%arg0: i32, %arg1: memref<64x16xf32, #tpu.memory_space<vmem>>, %arg2: memref<16x128xf32, #tpu.memory_space<vmem>>, %arg3: memref<1x128xf32, #tpu.memory_space<vmem>>, %arg4: memref<128x128xf32, #tpu.memory_space<vmem>>, %arg5: memref<1x128xf32, #tpu.memory_space<vmem>>, %arg6: memref<2x128xf32, #tpu.memory_space<vmem>>, %arg7: memref<8x128xf32, #tpu.memory_space<vmem>>) attributes {dimension_semantics = [#tpu.dimension_semantics<parallel>], iteration_bounds = array<i64: 1>, scalar_prefetch = 0 : i64, scratch_operands = 0 : i64, tpu.core_type = #tpu.core_type<tc>, window_params = [{transform_indices = @transform_0, window_bounds = array<i64: 64, 16>}, {pipeline_mode = #tpu.pipeline_mode<synchronous>, transform_indices = @transform_1, window_bounds = array<i64: 16, 128>}, {pipeline_mode = #tpu.pipeline_mode<synchronous>, transform_indices = @transform_2, window_bounds = array<i64: 1, 128>}, {pipeline_mode = #tpu.pipeline_mode<synchronous>, transform_indices = @transform_3, window_bounds = array<i64: 128, 128>}, {pipeline_mode = #tpu.pipeline_mode<synchronous>, transform_indices = @transform_4, window_bounds = array<i64: 1, 128>}, {pipeline_mode = #tpu.pipeline_mode<synchronous>, transform_indices = @transform_5, window_bounds = array<i64: 2, 128>}, {transform_indices = @transform_6, window_bounds = array<i64: 8, 128>}]} {
    %c0 = arith.constant 0 : index
    %c0_0 = arith.constant 0 : index
    %0 = vector.load %arg1[%c0, %c0_0] : memref<64x16xf32, #tpu.memory_space<vmem>>, vector<64x16xf32>
    %c0_1 = arith.constant 0 : index
    %c0_2 = arith.constant 0 : index
    %1 = vector.load %arg2[%c0_1, %c0_2] : memref<16x128xf32, #tpu.memory_space<vmem>>, vector<16x128xf32>
    %cst = arith.constant dense<0.000000e+00> : vector<64x128xf32>
    %2 = tpu.matmul %0, %1, %cst {dimension_numbers = #tpu.dot_dimension_numbers<[1], [0], [0], [1], [0, 0, 1, 1], [], []>, precision = #tpu.contract_precision<fp32>} : vector<64x16xf32>, vector<16x128xf32>, vector<64x128xf32> -> vector<64x128xf32>
    %c0_3 = arith.constant 0 : index
    %c0_4 = arith.constant 0 : index
    %3 = vector.load %arg3[%c0_3, %c0_4] : memref<1x128xf32, #tpu.memory_space<vmem>>, vector<1x128xf32>
    %4 = vector.broadcast %3 : vector<1x128xf32> to vector<64x128xf32>
    %5 = arith.addf %2, %4 : vector<64x128xf32>
    %cst_5 = arith.constant 0.000000e+00 : f32
    %6 = vector.broadcast %cst_5 : f32 to vector<64x128xf32>
    %7 = arith.maximumf %5, %6 : vector<64x128xf32>
    %c0_6 = arith.constant 0 : index
    %c0_7 = arith.constant 0 : index
    %8 = vector.load %arg4[%c0_6, %c0_7] : memref<128x128xf32, #tpu.memory_space<vmem>>, vector<128x128xf32>
    %cst_8 = arith.constant dense<0.000000e+00> : vector<64x128xf32>
    %9 = tpu.matmul %7, %8, %cst_8 {dimension_numbers = #tpu.dot_dimension_numbers<[1], [0], [0], [1], [0, 0, 1, 1], [], []>, precision = #tpu.contract_precision<fp32>} : vector<64x128xf32>, vector<128x128xf32>, vector<64x128xf32> -> vector<64x128xf32>
    %c0_9 = arith.constant 0 : index
    %c0_10 = arith.constant 0 : index
    %10 = vector.load %arg5[%c0_9, %c0_10] : memref<1x128xf32, #tpu.memory_space<vmem>>, vector<1x128xf32>
    %11 = vector.broadcast %10 : vector<1x128xf32> to vector<64x128xf32>
    %12 = arith.addf %9, %11 : vector<64x128xf32>
    %c0_11 = arith.constant 0 : index
    %c0_12 = arith.constant 0 : index
    %13 = vector.load %arg6[%c0_11, %c0_12] : memref<2x128xf32, #tpu.memory_space<vmem>>, vector<1x128xf32>
    %14 = vector.broadcast %13 : vector<1x128xf32> to vector<64x128xf32>
    %15 = arith.addf %12, %14 : vector<64x128xf32>
    %cst_13 = arith.constant dense<0xFF800000> : vector<64xf32>
    %16 = vector.multi_reduction <maximumf>, %15, %cst_13 [1] : vector<64x128xf32> to vector<64xf32>
    %17 = vector.shape_cast %16 : vector<64xf32> to vector<64x1xf32>
    %18 = vector.broadcast %17 : vector<64x1xf32> to vector<64x128xf32>
    %19 = arith.subf %15, %18 : vector<64x128xf32>
    %20 = math.exp %19 : vector<64x128xf32>
    %cst_14 = arith.constant dense<0.000000e+00> : vector<64xf32>
    %21 = vector.multi_reduction <add>, %20, %cst_14 [1] : vector<64x128xf32> to vector<64xf32>
    %22 = vector.shape_cast %21 : vector<64xf32> to vector<64x1xf32>
    %23 = vector.broadcast %22 : vector<64x1xf32> to vector<64x128xf32>
    %24 = arith.divf %20, %23 : vector<64x128xf32>
    %c1 = arith.constant 1 : index
    %c0_15 = arith.constant 0 : index
    %25 = vector.load %arg6[%c1, %c0_15] : memref<2x128xf32, #tpu.memory_space<vmem>>, vector<1x128xf32>
    %26 = vector.broadcast %25 : vector<1x128xf32> to vector<64x128xf32>
    %27 = arith.mulf %12, %26 : vector<64x128xf32>
    %28 = arith.addf %24, %27 : vector<64x128xf32>
    %29 = vector.extract_strided_slice %28 {offsets = [0, 0], sizes = [8, 16], strides = [1, 1]} : vector<64x128xf32> to vector<8x16xf32>
    %30 = vector.extract_strided_slice %28 {offsets = [8, 0], sizes = [8, 16], strides = [1, 1]} : vector<64x128xf32> to vector<8x16xf32>
    %31 = vector.extract_strided_slice %28 {offsets = [16, 0], sizes = [8, 16], strides = [1, 1]} : vector<64x128xf32> to vector<8x16xf32>
    %32 = vector.extract_strided_slice %28 {offsets = [24, 0], sizes = [8, 16], strides = [1, 1]} : vector<64x128xf32> to vector<8x16xf32>
    %33 = vector.extract_strided_slice %28 {offsets = [32, 0], sizes = [8, 16], strides = [1, 1]} : vector<64x128xf32> to vector<8x16xf32>
    %34 = vector.extract_strided_slice %28 {offsets = [40, 0], sizes = [8, 16], strides = [1, 1]} : vector<64x128xf32> to vector<8x16xf32>
    %35 = vector.extract_strided_slice %28 {offsets = [48, 0], sizes = [8, 16], strides = [1, 1]} : vector<64x128xf32> to vector<8x16xf32>
    %36 = vector.extract_strided_slice %28 {offsets = [56, 0], sizes = [8, 16], strides = [1, 1]} : vector<64x128xf32> to vector<8x16xf32>
    %37 = tpu.concatenate %29, %30, %31, %32, %33, %34, %35, %36 in 1 : vector<8x16xf32>, vector<8x16xf32>, vector<8x16xf32>, vector<8x16xf32>, vector<8x16xf32>, vector<8x16xf32>, vector<8x16xf32>, vector<8x16xf32> -> vector<8x128xf32>
    %c0_16 = arith.constant 0 : index
    %c0_17 = arith.constant 0 : index
    %38 = vector.load %arg7[%c0_16, %c0_17] : memref<8x128xf32, #tpu.memory_space<vmem>>, vector<8x128xf32>
    tpu.vector_store %arg7[%c0_16, %c0_17], %37 {strides = array<i32>} : memref<8x128xf32, #tpu.memory_space<vmem>>, vector<8x128xf32>,
    return
  }
  func.func @transform_0(%arg0: i32) -> (i32, i32) {
    %c0_i32 = arith.constant 0 : i32
    %c0_i32_0 = arith.constant 0 : i32
    return %arg0, %c0_i32 : i32, i32
  }
  func.func @transform_1(%arg0: i32) -> (i32, i32) {
    %c0_i32 = arith.constant 0 : i32
    %c0_i32_0 = arith.constant 0 : i32
    %c0_i32_1 = arith.constant 0 : i32
    return %c0_i32, %c0_i32_0 : i32, i32
  }
  func.func @transform_2(%arg0: i32) -> (i32, i32) {
    %c0_i32 = arith.constant 0 : i32
    %c0_i32_0 = arith.constant 0 : i32
    %c0_i32_1 = arith.constant 0 : i32
    return %c0_i32, %c0_i32_0 : i32, i32
  }
  func.func @transform_3(%arg0: i32) -> (i32, i32) {
    %c0_i32 = arith.constant 0 : i32
    %c0_i32_0 = arith.constant 0 : i32
    %c0_i32_1 = arith.constant 0 : i32
    return %c0_i32, %c0_i32_0 : i32, i32
  }
  func.func @transform_4(%arg0: i32) -> (i32, i32) {
    %c0_i32 = arith.constant 0 : i32
    %c0_i32_0 = arith.constant 0 : i32
    %c0_i32_1 = arith.constant 0 : i32
    return %c0_i32, %c0_i32_0 : i32, i32
  }
  func.func @transform_5(%arg0: i32) -> (i32, i32) {
    %c0_i32 = arith.constant 0 : i32
    %c0_i32_0 = arith.constant 0 : i32
    %c0_i32_1 = arith.constant 0 : i32
    return %c0_i32, %c0_i32_0 : i32, i32
  }
  func.func @transform_6(%arg0: i32) -> (i32, i32) {
    %c0_i32 = arith.constant 0 : i32
    %c0_i32_0 = arith.constant 0 : i32
    return %arg0, %c0_i32 : i32, i32
  }
}

</mosaic_0001>

<bundles_post_ra>
// kernel: tpu_custom_call.1
= control target key start
LH: loop header
LB: loop body
LE: loop exit
PB: predicated region body
PF: predicated region fallthrough
CT: control target
= control target key end

     0   :  { %11 = vsyncpa [#allocation3], 0  ;;  %s1964_s0 = inlined_call_operand.vmem [shape: f32[64,16], index: 0, kind: input, shape index: {}]   ;;  %s1965_s1 = inlined_call_operand.vmem [shape: f32[16,128], index: 1, kind: input, shape index: {}]   ;;  %s1966_s2 = inlined_call_operand.vmem [shape: f32[1,128], index: 2, kind: input, shape index: {}]   ;;  %s1967_s3 = inlined_call_operand.hbm [shape: f32[128,128], index: 3, kind: input, shape index: {}]   ;;  %s1968_s4 = inlined_call_operand.vmem [shape: f32[1,128], index: 4, kind: input, shape index: {}]   ;;  %s1969_s5 = inlined_call_operand.vmem [shape: f32[2,128], index: 5, kind: input, shape index: {}]   ;;  %s1970_s6 = inlined_call_operand.hbm [shape: f32[8,128], index: 6, kind: output, shape index: {}]  }
   0x1   :  { %12 = vsyncpa [#allocation4], 0  ;;  %s23_s23 = sshll.u32 %s1967_s3, 4  ;;  %s1403_s24 = smov [#allocation2]   ;;  %s24_s23 = int_to_ptr.hbm [resolvable:$true] %s23_s23 }
   0x2   :  { %s25_s25 = sshll.u32 %s1403_s24, 4  ;;  %s1404_s26 = smov 128   ;;  %s26_s25 = int_to_ptr.vmem [resolvable:$true] %s25_s25 }
   0x3   :  { %s1405_s27 = smov 8  }
   0x4   :  { %31 = dma.hbm_to_vmem [thread:$0]  %s24_s23, 2048, %s26_s25, [#allocation3], %s1404_s26, %s1404_s26, %s1405_s27  }
   0x5   :  { %1399 = dma.done.wait [#allocation3], 2048  }
   0x6   :  { %1400 = vsyncadd [#allocation3], 4294965248  ;;  %vm54_vm0 = vcmask 130048   ;;  %v49_v0 = vld [vmem:[%s1965_s1 + $0x8] sm:$0xff]  ;;  %v48_v1 = vld [vmem:[%s1965_s1] sm:$0xff]  ;;  %s1407_s27 = smov 32  }
   0x7   :  { %v40_v2 = vld [vmem:[%s1964_s0] sm:$0xff]  ;;  %v93_v3 = vand.u32 4294901760, %v49_v0  ;;  %v95_v4 = vand.u32 4294901760, %v48_v1  ;;  %v41_v6 = vld [vmem:[%s1964_s0 + $0x8] sm:$0xff]  ;;  %v42_v9 = vld [vmem:[%s1964_s0 + $0x10] sm:$0xff]  ;;  %s1408_s28 = smov 48  }
   0x8   :  { %v56_v5 = vsel %vm54_vm0, %v40_v2, 0  ;;  %v59_v8 = vsel %vm54_vm0, %v41_v6, 0  ;;  %v62_v17 = vsel %vm54_vm0, %v42_v9, 0  ;;  %v43_v27 = vld [vmem:[%s1964_s0 + $0x18] sm:$0xff]  ;;  %v44_v34 = vld [vmem:[%s1964_s0 + $0x20] sm:$0xff]  ;;  %v45_v41 = vld [vmem:[%s1964_s0 + $0x28] sm:$0xff] }
   0x9   :  { %v1465_v7 = vand.u32 4294901760, %v56_v5  ;;  %v177_v10 = vsub.f32 %v49_v0, %v93_v3  ;;  %94 = vmatpush.msra.mxu0 %v93_v3  ;;  %v183_v11 = vsub.f32 %v48_v1, %v95_v4  ;;  %297 = vmatpush.msra.mxu3 %v93_v3  ;;  %v1471_v12 = vand.u32 4294901760, %v59_v8  ;;  %v46_v48 = vld [vmem:[%s1964_s0 + $0x30] sm:$0xff]  ;;  %v47_v55 = vld [vmem:[%s1964_s0 + $0x38] sm:$0xff]  ;;  %s1409_s29 = smov 64   ;;  %s1410_s30 = smov 80  }
   0xa   :  { %v1476_v23 = vand.u32 4294901760, %v62_v17  ;;  %v65_v30 = vsel %vm54_vm0, %v43_v27, 0  ;;  %v68_v37 = vsel %vm54_vm0, %v44_v34, 0  ;;  %v71_v44 = vsel %vm54_vm0, %v45_v41, 0  ;;  %s1411_s7 = smov 96   ;;  %s1412_s8 = smov 112  }
   0xb   :  { %v98_v13 = vsub.f32 %v56_v5, %v1465_v7  ;;  %237 = vmatpush.msra.mxu2 %v177_v10  ;;  %96 = vmatpush.msra.mxu0 %v95_v4  ;;  %v178_v14 = vand.u32 4294901760, %v177_v10  ;;  %v184_v15 = vand.u32 4294901760, %v183_v11  ;;  %v106_v16 = vsub.f32 %v59_v8, %v1471_v12  ;;  %s1413_s3 = smov [#allocation5]   ;;  %s1294_s12 = sshll.u32 %s1970_s6, 4  ;;  %s1295_s12 = int_to_ptr.hbm [resolvable:$true] %s1294_s12 }
   0xc   :  { %299 = vmatpush.msra.mxu3 %v95_v4  ;;  %v114_v29 = vsub.f32 %v62_v17, %v1476_v23  ;;  %v1484_v33 = vand.u32 4294901760, %v65_v30  ;;  %v129_v40 = vand.u32 4294901760, %v68_v37  ;;  %v137_v47 = vand.u32 4294901760, %v71_v44  ;;  %s1292_s9 = sshll.u32 %s1413_s3, 4  ;;  %s1293_s9 = int_to_ptr.vmem [resolvable:$true] %s1292_s9 }
   0xd   :  { %v99_v18 = vand.u32 4294901760, %v98_v13  ;;  %240 = vmatpush.msra.mxu2 %v183_v11  ;;  %v179_v19 = vsub.f32 %v177_v10, %v178_v14  ;;  %366 = vmatpush.msrb.mxu0 %v178_v14  ;;  %v185_v20 = vsub.f32 %v183_v11, %v184_v15  ;;  %v107_v22 = vand.u32 4294901760, %v106_v16 }
   0xe   :  { %243 = vmatmul.f32.vlgmr.msra.gmra.mxu2 %v98_v13  ;;  %v115_v32 = vand.u32 4294901760, %v114_v29  ;;  %v122_v36 = vsub.f32 %v65_v30, %v1484_v33  ;;  %v130_v43 = vsub.f32 %v68_v37, %v129_v40  ;;  %v138_v50 = vsub.f32 %v71_v44, %v137_v47 }
   0xf   :  { %v100_v21 = vsub.f32 %v98_v13, %v99_v18  ;;  %303 = vmatmul.f32.vlgmr.msra.gmra.mxu3 %v99_v18  ;;  %v180_v24 = vand.u32 4294901760, %v179_v19  ;;  %v186_v25 = vand.u32 4294901760, %v185_v20  ;;  %370 = vmatpush.msrb.mxu0 %v184_v15  ;;  %v108_v28 = vsub.f32 %v106_v16, %v107_v22  ;;  %v475_v18 = vld [vmem:[#allocation2 + $0x60] sm:$0xff] }
  0x10   :  { %v116_v35 = vsub.f32 %v114_v29, %v115_v32  ;;  %v123_v39 = vand.u32 4294901760, %v122_v36  ;;  %v131_v46 = vand.u32 4294901760, %v130_v43  ;;  %v74_v51 = vsel %vm54_vm0, %v46_v48, 0 }
  0x11   :  { %v101_v26 = vand.u32 4294901760, %v100_v21  ;;  %181 = vmatpush.msra.mxu1 %v180_v24  ;;  %v109_v31 = vand.u32 4294901760, %v108_v28  ;;  %v139_v53 = vand.u32 4294901760, %v138_v50  ;;  %v145_v54 = vand.u32 4294901760, %v74_v51 }
  0x12   :  { %v117_v38 = vand.u32 4294901760, %v116_v35  ;;  %v124_v42 = vsub.f32 %v122_v36, %v123_v39  ;;  %v132_v49 = vsub.f32 %v130_v43, %v131_v46  ;;  %v77_v58 = vsel %vm54_vm0, %v47_v55, 0  ;;  %v469_v55 = vld [vmem:[#allocation2 + $0x30] sm:$0xff] }
  0x13   :  { %102 = vmatmul.f32.vlgmr.msra.gmra.mxu0 %v101_v26  ;;  %187 = vmatpush.msra.mxu1 %v186_v25  ;;  %v140_v56 = vsub.f32 %v138_v50, %v139_v53  ;;  %v146_v57 = vsub.f32 %v74_v51, %v145_v54  ;;  %v153_v61 = vand.u32 4294901760, %v77_v58  ;;  %v1545_v21 = vand.u32 4294901760, %v475_v18  ;;  %v474_v25 = vld [vmem:[#allocation2 + $0x58] sm:$0xff] }
  0x14   :  { %189 = vmatmul.f32.vlgmr.msra.gmra.mxu1 %v1465_v7  ;;  %v125_v45 = vand.u32 4294901760, %v124_v42  ;;  %v133_v52 = vand.u32 4294901760, %v132_v49 }
  0x15   :  { %419 = vmatpush.msrb.mxu1 %v93_v3  ;;  %v141_v59 = vand.u32 4294901760, %v140_v56  ;;  %v147_v60 = vand.u32 4294901760, %v146_v57  ;;  %v154_v63 = vsub.f32 %v77_v58, %v153_v61  ;;  %v1556_v24 = vsub.f32 %v475_v18, %v1545_v21 }
  0x16   :  { %248 = vmatmul.f32.gmra.mxu2 %v106_v16 }
  0x17   :  { %309 = vmatmul.f32.gmra.mxu3 %v107_v22  ;;  %421 = vmatpush.msrb.mxu1 %v95_v4  ;;  %v148_v62 = vsub.f32 %v146_v57, %v147_v60  ;;  %v155_v1 = vand.u32 4294901760, %v154_v63  ;;  %v478_v4 = vld [vmem:[#allocation2 + $0x78] sm:$0xff]  ;;  %v600_v28 = vand.u32 4294901760, %v1556_v24 }
  0x18   :  { %v1514_v5 = vand.u32 4294901760, %v478_v4 }
  0x19   :  { %v149_v0 = vand.u32 4294901760, %v148_v62  ;;  %v156_v2 = vsub.f32 %v154_v63, %v155_v1  ;;  %v601_v30 = vsub.f32 %v1556_v24, %v600_v28 }
  0x1a   :  { %484 = vmatpush.msrb.mxu2 %v1514_v5  ;;  %v1518_v6 = vsub.f32 %v478_v4, %v1514_v5  ;;  %799 = vmatpush.msra.mxu1 %v1514_v5 }
  0x1b   :  { %110 = vmatmul.f32.gmra.mxu0 %v109_v31  ;;  %v157_v3 = vand.u32 4294901760, %v156_v2  ;;  %v467_v2 = vld [vmem:[#allocation2 + $0x20] sm:$0xff] }
  0x1c   :  { %193 = vmatmul.f32.gmra.mxu1 %v1471_v12  ;;  %v582_v8 = vand.u32 4294901760, %v1518_v6  ;;  %711 = vmatpush.msra.mxu0 %v1518_v6 }
  0x1e   :  { %253 = vmatmul.f32.gmra.mxu2 %v114_v29  ;;  %v583_v10 = vsub.f32 %v1518_v6, %v582_v8  ;;  %v1562_v29 = vand.u32 4294901760, %v474_v25 }
  0x1f   :  { %315 = vmatmul.f32.gmra.mxu3 %v115_v32  ;;  %v473_v32 = vld [vmem:[#allocation2 + $0x50] sm:$0xff] }
  0x20   :  { %v584_v13 = vand.u32 4294901760, %v583_v10  ;;  %v1570_v31 = vsub.f32 %v474_v25, %v1562_v29  ;;  %v1574_v35 = vand.u32 4294901760, %v473_v32 }
  0x22   :  { %585 = vmatpush.msrb.mxu3 %v584_v13  ;;  %v606_v34 = vand.u32 4294901760, %v1570_v31  ;;  %v466_v13 = vld [vmem:[#allocation2 + $0x18] sm:$0xff] }
  0x23   :  { %118 = vmatmul.f32.gmra.mxu0 %v117_v38  ;;  %v1584_v38 = vsub.f32 %v473_v32, %v1574_v35  ;;  %v1658_v25 = vand.u32 4294901760, %v466_v13 }
  0x24   :  { %197 = vmatmul.f32.gmra.mxu1 %v1476_v23  ;;  %v607_v37 = vsub.f32 %v1570_v31, %v606_v34 }
  0x25   :  { %v612_v42 = vand.u32 4294901760, %v1584_v38 }
  0x26   :  { %258 = vmatmul.f32.gmra.mxu2 %v122_v36  ;;  %v608_v41 = vand.u32 4294901760, %v607_v37 }
  0x27   :  { %321 = vmatmul.f32.gmra.mxu3 %v123_v39  ;;  %v472_v39 = vld [vmem:[#allocation2 + $0x48] sm:$0xff]  ;;  %v613_v44 = vsub.f32 %v1584_v38, %v612_v42 }
  0x2b   :  { %126 = vmatmul.f32.gmra.mxu0 %v125_v45 }
  0x2c   :  { %201 = vmatmul.f32.gmra.mxu1 %v1484_v33 }
  0x2e   :  { %263 = vmatmul.f32.gmra.mxu2 %v130_v43  ;;  %v1590_v43 = vand.u32 4294901760, %v472_v39 }
  0x2f   :  { %327 = vmatmul.f32.gmra.mxu3 %v131_v46  ;;  %v471_v46 = vld [vmem:[#allocation2 + $0x40] sm:$0xff] }
  0x30   :  { %v1598_v45 = vsub.f32 %v472_v39, %v1590_v43  ;;  %v1602_v49 = vand.u32 4294901760, %v471_v46  ;;  %v1671_v39 = vsub.f32 %v466_v13, %v1658_v25 }
  0x32   :  { %v618_v48 = vand.u32 4294901760, %v1598_v45 }
  0x33   :  { %134 = vmatmul.f32.gmra.mxu0 %v133_v52 }
  0x34   :  { %205 = vmatmul.f32.gmra.mxu1 %v129_v40  ;;  %v619_v52 = vsub.f32 %v1598_v45, %v618_v48 }
  0x36   :  { %268 = vmatmul.f32.gmra.mxu2 %v138_v50  ;;  %v470_v50 = vld [vmem:[#allocation2 + $0x38] sm:$0xff] }
  0x37   :  { %333 = vmatmul.f32.gmra.mxu3 %v139_v53  ;;  %v1612_v53 = vsub.f32 %v471_v46, %v1602_v49  ;;  %v464_v46 = vld [vmem:[#allocation2 + $0x8] sm:$0xff] }
  0x39   :  { %v624_v58 = vand.u32 4294901760, %v1612_v53 }
  0x3b   :  { %142 = vmatmul.f32.gmra.mxu0 %v141_v59  ;;  %v625_v62 = vsub.f32 %v1612_v53, %v624_v58 }
  0x3c   :  { %209 = vmatmul.f32.gmra.mxu1 %v137_v47 }
  0x3e   :  { %273 = vmatmul.f32.gmra.mxu2 %v146_v57  ;;  %v620_v57 = vand.u32 4294901760, %v619_v52 }
  0x3f   :  { %339 = vmatmul.f32.gmra.mxu3 %v147_v60  ;;  %v1624_v60 = vand.u32 4294901760, %v469_v55 }
  0x43   :  { %150 = vmatmul.f32.gmra.mxu0 %v149_v0  ;;  %v1634_v0 = vsub.f32 %v469_v55, %v1624_v60  ;;  %v1683_v55 = vand.u32 4294901760, %v464_v46 }
  0x44   :  { %213 = vmatmul.f32.gmra.mxu1 %v145_v54 }
  0x46   :  { %278 = vmatmul.f32.gmra.mxu2 %v154_v63 }
  0x47   :  { %345 = vmatmul.f32.gmra.mxu3 %v155_v1 }
  0x4b   :  { %158 = vmatmul.f32.gmra.mxu0 %v157_v3  ;;  %v626_v3 = vand.u32 4294901760, %v625_v62 }
  0x4c   :  { %217 = vmatmul.f32.gmra.mxu1 %v153_v61 }
  0x53   :  { %372 = vmatmul.f32.vlgmr.msrb.gmra.mxu0 %v1465_v7 }
  0x54   :  { %423 = vmatmul.f32.vlgmr.msrb.gmra.mxu1 %v1465_v7  ;;  %v477_v7 = vld [vmem:[#allocation2 + $0x70] sm:$0xff] }
  0x55   :  { %v1522_v9 = vand.u32 4294901760, %v477_v7 }
  0x57   :  { %486 = vmatpush.msrb.mxu2 %v1522_v9  ;;  %v1530_v11 = vsub.f32 %v477_v7, %v1522_v9  ;;  %801 = vmatpush.msra.mxu1 %v1522_v9  ;;  %v636_v7 = vand.u32 4294901760, %v1634_v0 }
  0x59   :  { %v588_v14 = vand.u32 4294901760, %v1530_v11  ;;  %714 = vmatpush.msra.mxu0 %v1530_v11 }
  0x5b   :  { %376 = vmatmul.f32.gmra.mxu0 %v1471_v12  ;;  %v589_v16 = vsub.f32 %v1530_v11, %v588_v14 }
  0x5c   :  { %427 = vmatmul.f32.gmra.mxu1 %v1471_v12  ;;  %v476_v12 = vld [vmem:[#allocation2 + $0x68] sm:$0xff] }
  0x5d   :  { %v1534_v15 = vand.u32 4294901760, %v476_v12  ;;  %v590_v19 = vand.u32 4294901760, %v589_v16 }
  0x5f   :  { %488 = vmatpush.msrb.mxu2 %v1534_v15  ;;  %v1542_v17 = vsub.f32 %v476_v12, %v1534_v15  ;;  %803 = vmatpush.msra.mxu1 %v1534_v15  ;;  %v1648_v12 = vand.u32 4294901760, %v467_v2 }
  0x60   :  { %591 = vmatpush.msrb.mxu3 %v590_v19  ;;  %v637_v19 = vsub.f32 %v1634_v0, %v636_v7 }
  0x61   :  { %v594_v20 = vand.u32 4294901760, %v1542_v17  ;;  %717 = vmatpush.msra.mxu0 %v1542_v17  ;;  %490 = vmatpush.msrb.mxu2 %v1545_v21 }
  0x62   :  { %805 = vmatpush.msra.mxu1 %v1545_v21 }
  0x63   :  { %380 = vmatmul.f32.gmra.mxu0 %v1476_v23  ;;  %492 = vmatpush.msrb.mxu2 %v1562_v29 }
  0x64   :  { %431 = vmatmul.f32.gmra.mxu1 %v1476_v23  ;;  %v595_v23 = vsub.f32 %v1542_v17, %v594_v20  ;;  %720 = vmatpush.msra.mxu0 %v1556_v24 }
  0x65   :  { %807 = vmatpush.msra.mxu1 %v1562_v29  ;;  %494 = vmatpush.msrb.mxu2 %v1574_v35 }
  0x66   :  { %v596_v27 = vand.u32 4294901760, %v595_v23  ;;  %723 = vmatpush.msra.mxu0 %v1570_v31 }
  0x67   :  { %809 = vmatpush.msra.mxu1 %v1574_v35  ;;  %496 = vmatpush.msrb.mxu2 %v1590_v43 }
  0x68   :  { %597 = vmatpush.msrb.mxu3 %v596_v27  ;;  %726 = vmatpush.msra.mxu0 %v1584_v38  ;;  %v1662_v27 = vsub.f32 %v467_v2, %v1648_v12 }
  0x69   :  { %811 = vmatpush.msra.mxu1 %v1590_v43  ;;  %498 = vmatpush.msrb.mxu2 %v1602_v49 }
  0x6a   :  { %729 = vmatpush.msra.mxu0 %v1598_v45 }
  0x6b   :  { %384 = vmatmul.f32.gmra.mxu0 %v1484_v33  ;;  %813 = vmatpush.msra.mxu1 %v1602_v49 }
  0x6c   :  { %435 = vmatmul.f32.gmra.mxu1 %v1484_v33  ;;  %v602_v33 = vand.u32 4294901760, %v601_v30  ;;  %732 = vmatpush.msra.mxu0 %v1612_v53  ;;  %v465_v30 = vld [vmem:[#allocation2 + $0x10] sm:$0xff] }
  0x6e   :  { %603 = vmatpush.msrb.mxu3 %v602_v33  ;;  %v638_v33 = vand.u32 4294901760, %v637_v19 }
  0x70   :  { %609 = vmatpush.msrb.mxu3 %v608_v41  ;;  %v1673_v41 = vand.u32 4294901760, %v465_v30 }
  0x72   :  { %v1681_v52 = vsub.f32 %v465_v30, %v1673_v41 }
  0x73   :  { %388 = vmatmul.f32.gmra.mxu0 %v129_v40 }
  0x74   :  { %439 = vmatmul.f32.gmra.mxu1 %v129_v40  ;;  %v1972_v2 = vand.u32 4294901760, %v1681_v52 }
  0x76   :  { %v661_v30 = vsub.f32 %v1681_v52, %v1972_v2 }
  0x7b   :  { %392 = vmatmul.f32.gmra.mxu0 %v137_v47 }
  0x7c   :  { %443 = vmatmul.f32.gmra.mxu1 %v137_v47  ;;  %v614_v47 = vand.u32 4294901760, %v613_v44  ;;  %v648_v44 = vand.u32 4294901760, %v1662_v27 }
  0x7e   :  { %615 = vmatpush.msrb.mxu3 %v614_v47 }
  0x80   :  { %621 = vmatpush.msrb.mxu3 %v620_v57  ;;  %v649_v57 = vsub.f32 %v1662_v27, %v648_v44 }
  0x82   :  { %627 = vmatpush.msrb.mxu3 %v626_v3  ;;  %v1696_v3 = vsub.f32 %v464_v46, %v1683_v55  ;;  %v650_v13 = vand.u32 4294901760, %v649_v57 }
  0x83   :  { %396 = vmatmul.f32.gmra.mxu0 %v145_v54 }
  0x84   :  { %447 = vmatmul.f32.gmra.mxu1 %v145_v54  ;;  %v1614_v54 = vand.u32 4294901760, %v470_v50 }
  0x86   :  { %500 = vmatpush.msrb.mxu2 %v1614_v54  ;;  %v1622_v59 = vsub.f32 %v470_v50, %v1614_v54  ;;  %815 = vmatpush.msra.mxu1 %v1614_v54  ;;  %v654_v50 = vand.u32 4294901760, %v1671_v39 }
  0x88   :  { %v630_v63 = vand.u32 4294901760, %v1622_v59  ;;  %502 = vmatpush.msrb.mxu2 %v1624_v60  ;;  %735 = vmatpush.msra.mxu0 %v1622_v59  ;;  %v655_v62 = vsub.f32 %v1671_v39, %v654_v50 }
  0x89   :  { %817 = vmatpush.msra.mxu1 %v1624_v60 }
  0x8a   :  { %v631_v4 = vsub.f32 %v1622_v59, %v630_v63  ;;  %738 = vmatpush.msra.mxu0 %v1634_v0  ;;  %v656_v19 = vand.u32 4294901760, %v655_v62 }
  0x8b   :  { %400 = vmatmul.f32.gmra.mxu0 %v153_v61 }
  0x8c   :  { %451 = vmatmul.f32.gmra.mxu1 %v153_v61  ;;  %v468_v61 = vld [vmem:[#allocation2 + $0x28] sm:$0xff]  ;;  %v632_v18 = vand.u32 4294901760, %v631_v4 }
  0x8d   :  { %v1636_v1 = vand.u32 4294901760, %v468_v61 }
  0x8e   :  { %633 = vmatpush.msrb.mxu3 %v632_v18 }
  0x8f   :  { %504 = vmatpush.msrb.mxu2 %v1636_v1  ;;  %v1646_v10 = vsub.f32 %v468_v61, %v1636_v1  ;;  %819 = vmatpush.msra.mxu1 %v1636_v1  ;;  %v463_v61 = vld [vmem:[#allocation2] sm:$0xff] }
  0x90   :  { %v1549_v22 = vpop.f32.mrf.mxu0  ;;  %639 = vmatpush.msrb.mxu3 %v638_v33  ;;  %v1698_v4 = vand.u32 4294901760, %v463_v61  ;;  %v1971_v33 = vand.u32 4294901760, %v1696_v3 }
  0x91   :  { %v1559_v26 = vpop.f32.mrf.mxu1  ;;  %v642_v23 = vand.u32 4294901760, %v1646_v10  ;;  %506 = vmatpush.msrb.mxu2 %v1648_v12  ;;  %741 = vmatpush.msra.mxu0 %v1646_v10 }
  0x92   :  { %821 = vmatpush.msra.mxu1 %v1648_v12  ;;  %v667_v57 = vsub.f32 %v1696_v3, %v1971_v33  ;;  %v304_v6 = vpop.f32.mrf.mxu3 }
  0x93   :  { %v643_v37 = vsub.f32 %v1646_v10, %v642_v23  ;;  %508 = vmatpush.msrb.mxu2 %v1658_v25  ;;  %744 = vmatpush.msra.mxu0 %v1662_v27 }
  0x94   :  { %823 = vmatpush.msra.mxu1 %v1658_v25 }
  0x95   :  { %v644_v47 = vand.u32 4294901760, %v643_v37  ;;  %747 = vmatpush.msra.mxu0 %v1671_v39  ;;  %510 = vmatpush.msrb.mxu2 %v1673_v41  ;;  %v1710_v37 = vsub.f32 %v463_v61, %v1698_v4  ;;  %v668_v61 = vand.u32 4294901760, %v667_v57 }
  0x96   :  { %825 = vmatpush.msra.mxu1 %v1673_v41 }
  0x97   :  { %645 = vmatpush.msrb.mxu3 %v644_v47  ;;  %750 = vmatpush.msra.mxu0 %v1681_v52  ;;  %v662_v47 = vand.u32 4294901760, %v661_v30  ;;  %v672_v62 = vand.u32 4294901760, %v1710_v37 }
  0x98   :  { %v1577_v36 = vpop.f32.mrf.mxu0  ;;  %512 = vmatpush.msrb.mxu2 %v1683_v55  ;;  %827 = vmatpush.msra.mxu1 %v1683_v55 }
  0x99   :  { %v1587_v40 = vpop.f32.mrf.mxu1  ;;  %651 = vmatpush.msrb.mxu3 %v650_v13  ;;  %753 = vmatpush.msra.mxu0 %v1696_v3  ;;  %v673_v13 = vsub.f32 %v1710_v37, %v672_v62 }
  0x9a   :  { %829 = vmatpush.msra.mxu1 %v1698_v4  ;;  %514 = vmatpush.msrb.mxu2 %v1698_v4  ;;  %v310_v17 = vpop.f32.mrf.mxu3 }
  0x9b   :  { %657 = vmatpush.msrb.mxu3 %v656_v19  ;;  %756 = vmatpush.msra.mxu0 %v1710_v37  ;;  %v674_v30 = vand.u32 4294901760, %v673_v13  ;;  %v244_v19 = vpop.f32.mrf.mxu2 }
  0x9c   :  { %882 = vmatpush.msra.mxu2 %v582_v8  ;;  %v1746_v8 = vld [vmem:[%s1966_s2] ss:$0 sm:$0xff] }
  0x9d   :  { %663 = vmatpush.msrb.mxu3 %v662_v47  ;;  %v104_v11 = vadd.f32 %v1746_v8, %v1549_v22  ;;  %v112_v24 = vadd.f32 %v1746_v8, %v1577_v36 }
  0x9e   :  { %886 = vmatpush.msra.mxu2 %v588_v14 }
  0x9f   :  { %669 = vmatpush.msrb.mxu3 %v668_v61  ;;  %v195_v31 = vadd.f32 %v1587_v40, %v112_v24 }
  0xa0   :  { %v1605_v51 = vpop.f32.mrf.mxu0  ;;  %890 = vmatpush.msra.mxu2 %v594_v20 }
  0xa1   :  { %v1617_v56 = vpop.f32.mrf.mxu1  ;;  %675 = vmatpush.msrb.mxu3 %v674_v30  ;;  %v120_v45 = vadd.f32 %v1746_v8, %v1605_v51 }
  0xa2   :  { %894 = vmatpush.msra.mxu2 %v600_v28  ;;  %v1973_v28 = vand.u32 4294901760, %v1681_v52  ;;  %v316_v38 = vpop.f32.mrf.mxu3 }
  0xa3   :  { %977 = vmatpush.msra.mxu3 %v1514_v5  ;;  %v249_v14 = vpop.f32.mrf.mxu2  ;;  %v199_v53 = vadd.f32 %v1617_v56, %v120_v45 }
  0xa4   :  { %898 = vmatpush.msra.mxu2 %v606_v34 }
  0xa5   :  { %979 = vmatpush.msra.mxu3 %v1522_v9 }
  0xa6   :  { %902 = vmatpush.msra.mxu2 %v612_v42 }
  0xa7   :  { %981 = vmatpush.msra.mxu3 %v1534_v15  ;;  %v191_v15 = vadd.f32 %v1559_v26, %v104_v11 }
  0xa8   :  { %v1652_v16 = vpop.f32.mrf.mxu0  ;;  %906 = vmatpush.msra.mxu2 %v618_v48 }
  0xa9   :  { %v1665_v32 = vpop.f32.mrf.mxu1  ;;  %983 = vmatpush.msra.mxu3 %v1545_v21  ;;  %v245_v22 = vadd.f32 %v244_v19, %v191_v15 }
  0xaa   :  { %910 = vmatpush.msra.mxu2 %v624_v58  ;;  %v322_v56 = vpop.f32.mrf.mxu3 }
  0xab   :  { %985 = vmatpush.msra.mxu3 %v1562_v29  ;;  %v254_v26 = vpop.f32.mrf.mxu2  ;;  %v305_v29 = vadd.f32 %v304_v6, %v245_v22 }
  0xac   :  { %914 = vmatpush.msra.mxu2 %v630_v63  ;;  %v255_v0 = vadd.f32 %v254_v26, %v199_v53 }
  0xad   :  { %987 = vmatpush.msra.mxu3 %v1574_v35  ;;  %v1974_v35 = vand.u32 4294901760, %v1696_v3 }
  0xae   :  { %918 = vmatpush.msra.mxu2 %v636_v7 }
  0xaf   :  { %989 = vmatpush.msra.mxu3 %v1590_v43  ;;  %v250_v43 = vadd.f32 %v249_v14, %v195_v31 }
  0xb0   :  { %v1703_v18 = vpop.f32.mrf.mxu0  ;;  %922 = vmatpush.msra.mxu2 %v642_v23 }
  0xb1   :  { %v1714_v46 = vpop.f32.mrf.mxu1  ;;  %991 = vmatpush.msra.mxu3 %v1602_v49  ;;  %v311_v49 = vadd.f32 %v310_v17, %v250_v43 }
  0xb2   :  { %926 = vmatpush.msra.mxu2 %v648_v44 }
  0xb3   :  { %993 = vmatpush.msra.mxu3 %v1614_v54  ;;  %v259_v58 = vpop.f32.mrf.mxu2 }
  0xb4   :  { %930 = vmatpush.msra.mxu2 %v654_v50 }
  0xb5   :  { %995 = vmatpush.msra.mxu3 %v1624_v60 }
  0xb6   :  { %934 = vmatpush.msra.mxu2 %v1973_v28 }
  0xb7   :  { %997 = vmatpush.msra.mxu3 %v1636_v1  ;;  %v128_v1 = vadd.f32 %v1746_v8, %v1652_v16 }
  0xb8   :  { %v1728_v33 = vpop.f32.mrf.mxu0  ;;  %938 = vmatpush.msra.mxu2 %v1974_v35 }
  0xb9   :  { %v1732_v2 = vpop.f32.mrf.mxu1  ;;  %999 = vmatpush.msra.mxu3 %v1648_v12  ;;  %v203_v27 = vadd.f32 %v1665_v32, %v128_v1  ;;  %v144_v17 = vadd.f32 %v1746_v8, %v1728_v33 }
  0xba   :  { %942 = vmatpush.msra.mxu2 %v672_v62  ;;  %v328_v62 = vpop.f32.mrf.mxu3 }
  0xbb   :  { %1001 = vmatpush.msra.mxu3 %v1658_v25  ;;  %v317_v25 = vadd.f32 %v316_v38, %v255_v0  ;;  %v264_v16 = vpop.f32.mrf.mxu2  ;;  %v260_v3 = vadd.f32 %v259_v58, %v203_v27  ;;  %v211_v31 = vadd.f32 %v1732_v2, %v144_v17 }
  0xbd   :  { %1003 = vmatpush.msra.mxu3 %v1673_v41  ;;  %v323_v61 = vadd.f32 %v322_v56, %v260_v3 }
  0xbf   :  { %1005 = vmatpush.msra.mxu3 %v1683_v55 }
  0xc0   :  { %v1748_v5 = vpop.f32.mrf.mxu0 }
  0xc1   :  { %v1753_v9 = vpop.f32.mrf.mxu1  ;;  %1007 = vmatpush.msra.mxu3 %v1698_v4  ;;  %v136_v4 = vadd.f32 %v1746_v8, %v1703_v18 }
  0xc3   :  { %v207_v13 = vadd.f32 %v1714_v46, %v136_v4  ;;  %v269_v26 = vpop.f32.mrf.mxu2 }
  0xc4   :  { %v270_v45 = vadd.f32 %v269_v26, %v211_v31 }
  0xc5   :  { %v265_v15 = vadd.f32 %v264_v16, %v207_v13 }
  0xc8   :  { %v1767_v20 = vpop.f32.mrf.mxu0 }
  0xc9   :  { %v1772_v21 = vpop.f32.mrf.mxu1 }
  0xcb   :  { %v274_v58 = vpop.f32.mrf.mxu2 }
  0xd0   :  { %v373_v34 = vpop.f32.mrf.mxu0 }
  0xd1   :  { %v374_v36 = vadd.f32 %v373_v34, %v305_v29  ;;  %v424_v42 = vpop.f32.mrf.mxu1  ;;  %v329_v29 = vadd.f32 %v328_v62, %v265_v15 }
  0xd3   :  { %v425_v48 = vadd.f32 %v424_v42, %v374_v36  ;;  %v334_v36 = vpop.f32.mrf.mxu3  ;;  %v279_v16 = vpop.f32.mrf.mxu2 }
  0xd5   :  { %v455_v40 = vmax.f32 %v425_v48, 0.0  ;;  %v152_v48 = vadd.f32 %v1746_v8, %v1748_v5 }
  0xd7   :  { %v1795_v54 = vand.u32 4294901760, %v455_v40 }
  0xd8   :  { %v377_v59 = vpop.f32.mrf.mxu0 }
  0xd9   :  { %v516_v60 = vsub.f32 %v455_v40, %v1795_v54  ;;  %v378_v63 = vadd.f32 %v377_v59, %v311_v49  ;;  %677 = vmatmul.f32.vlgmr.msrb.gmra.mxu3 %v1795_v54  ;;  %v428_v51 = vpop.f32.mrf.mxu1  ;;  %v335_v59 = vadd.f32 %v334_v36, %v270_v45 }
  0xdb   :  { %v429_v7 = vadd.f32 %v428_v51, %v378_v63  ;;  %759 = vmatmul.f32.vlgmr.msra.gmra.mxu0 %v516_v60  ;;  %v517_v10 = vand.u32 4294901760, %v516_v60  ;;  %v340_v5 = vpop.f32.mrf.mxu3 }
  0xdd   :  { %v456_v12 = vmax.f32 %v429_v7, 0.0  ;;  %833 = vmatmul.f32.vlgmr.msra.gmra.mxu1 %v517_v10  ;;  %v518_v23 = vsub.f32 %v516_v60, %v517_v10  ;;  %v215_v60 = vadd.f32 %v1753_v9, %v152_v48 }
  0xdf   :  { %v1803_v39 = vand.u32 4294901760, %v456_v12  ;;  %v519_v41 = vand.u32 4294901760, %v518_v23  ;;  %v275_v56 = vadd.f32 %v274_v58, %v215_v60 }
  0xe0   :  { %v381_v44 = vpop.f32.mrf.mxu0 }
  0xe1   :  { %v524_v50 = vsub.f32 %v456_v12, %v1803_v39  ;;  %v382_v52 = vadd.f32 %v381_v44, %v317_v25  ;;  %520 = vmatmul.f32.vlgmr.msrb.gmra.mxu2 %v519_v41  ;;  %681 = vmatmul.f32.gmra.mxu3 %v1803_v39  ;;  %v432_v55 = vpop.f32.mrf.mxu1  ;;  %v160_v12 = vadd.f32 %v1746_v8, %v1767_v20 }
  0xe2   :  { %v341_v41 = vadd.f32 %v340_v5, %v275_v56 }
  0xe3   :  { %v433_v37 = vadd.f32 %v432_v55, %v382_v52  ;;  %764 = vmatmul.f32.gmra.mxu0 %v524_v50  ;;  %v525_v47 = vand.u32 4294901760, %v524_v50  ;;  %v219_v44 = vadd.f32 %v1772_v21, %v160_v12 }
  0xe5   :  { %v457_v32 = vmax.f32 %v433_v37, 0.0  ;;  %839 = vmatmul.f32.gmra.mxu1 %v525_v47  ;;  %v526_v57 = vsub.f32 %v524_v50, %v525_v47  ;;  %v280_v47 = vadd.f32 %v279_v16, %v219_v44 }
  0xe7   :  { %v1810_v30 = vand.u32 4294901760, %v457_v32  ;;  %v527_v19 = vand.u32 4294901760, %v526_v57 }
  0xe8   :  { %v385_v6 = vpop.f32.mrf.mxu0 }
  0xe9   :  { %v532_v11 = vsub.f32 %v457_v32, %v1810_v30  ;;  %v386_v14 = vadd.f32 %v385_v6, %v323_v61  ;;  %528 = vmatmul.f32.gmra.mxu2 %v527_v19  ;;  %685 = vmatmul.f32.gmra.mxu3 %v1810_v30  ;;  %v436_v18 = vpop.f32.mrf.mxu1  ;;  %v346_v32 = vpop.f32.mrf.mxu3 }
  0xea   :  { %v347_v61 = vadd.f32 %v346_v32, %v280_v47 }
  0xeb   :  { %v437_v22 = vadd.f32 %v436_v18, %v386_v14  ;;  %769 = vmatmul.f32.gmra.mxu0 %v532_v11  ;;  %v533_v24 = vand.u32 4294901760, %v532_v11 }
  0xed   :  { %v458_v46 = vmax.f32 %v437_v22, 0.0  ;;  %845 = vmatmul.f32.gmra.mxu1 %v533_v24  ;;  %v534_v28 = vsub.f32 %v532_v11, %v533_v24 }
  0xef   :  { %v1817_v34 = vand.u32 4294901760, %v458_v46  ;;  %v535_v35 = vand.u32 4294901760, %v534_v28 }
  0xf0   :  { %v389_v38 = vpop.f32.mrf.mxu0 }
  0xf1   :  { %v540_v42 = vsub.f32 %v458_v46, %v1817_v34  ;;  %v390_v43 = vadd.f32 %v389_v38, %v329_v29  ;;  %536 = vmatmul.f32.gmra.mxu2 %v535_v35  ;;  %689 = vmatmul.f32.gmra.mxu3 %v1817_v34  ;;  %v440_v33 = vpop.f32.mrf.mxu1 }
  0xf3   :  { %v441_v40 = vadd.f32 %v440_v33, %v390_v43  ;;  %774 = vmatmul.f32.gmra.mxu0 %v540_v42  ;;  %v541_v49 = vand.u32 4294901760, %v540_v42 }
  0xf5   :  { %v459_v2 = vmax.f32 %v441_v40, 0.0  ;;  %851 = vmatmul.f32.gmra.mxu1 %v541_v49  ;;  %v542_v53 = vsub.f32 %v540_v42, %v541_v49 }
  0xf7   :  { %v1824_v63 = vand.u32 4294901760, %v459_v2  ;;  %v543_v51 = vand.u32 4294901760, %v542_v53 }
  0xf8   :  { %v393_v0 = vpop.f32.mrf.mxu0 }
  0xf9   :  { %v548_v1 = vsub.f32 %v459_v2, %v1824_v63  ;;  %v394_v7 = vadd.f32 %v393_v0, %v335_v59  ;;  %544 = vmatmul.f32.gmra.mxu2 %v543_v51  ;;  %693 = vmatmul.f32.gmra.mxu3 %v1824_v63  ;;  %v444_v10 = vpop.f32.mrf.mxu1 }
  0xfb   :  { %v445_v23 = vadd.f32 %v444_v10, %v394_v7  ;;  %779 = vmatmul.f32.gmra.mxu0 %v548_v1  ;;  %v549_v25 = vand.u32 4294901760, %v548_v1 }
  0xfd   :  { %v460_v9 = vmax.f32 %v445_v23, 0.0  ;;  %857 = vmatmul.f32.gmra.mxu1 %v549_v25  ;;  %v550_v27 = vsub.f32 %v548_v1, %v549_v25 }
  0xff   :  { %v555_v50 = vand.u32 4294901760, %v460_v9  ;;  %v551_v52 = vand.u32 4294901760, %v550_v27 }
 0x100   :  { %v397_v55 = vpop.f32.mrf.mxu0 }
 0x101   :  { %v556_v3 = vsub.f32 %v460_v9, %v555_v50  ;;  %v398_v4 = vadd.f32 %v397_v55, %v341_v41  ;;  %552 = vmatmul.f32.gmra.mxu2 %v551_v52  ;;  %697 = vmatmul.f32.gmra.mxu3 %v555_v50  ;;  %v448_v37 = vpop.f32.mrf.mxu1  ;;  %v1857_v41 = vld [vmem:[%s1969_s5 + $0x1] ss:$0 sm:$0xff] }
 0x103   :  { %v449_v8 = vadd.f32 %v448_v37, %v398_v4  ;;  %784 = vmatmul.f32.gmra.mxu0 %v556_v3  ;;  %v557_v20 = vand.u32 4294901760, %v556_v3 }
 0x105   :  { %v461_v57 = vmax.f32 %v449_v8, 0.0  ;;  %863 = vmatmul.f32.gmra.mxu1 %v557_v20  ;;  %v558_v62 = vsub.f32 %v556_v3, %v557_v20 }
 0x107   :  { %v563_v13 = vand.u32 4294901760, %v461_v57  ;;  %v559_v21 = vand.u32 4294901760, %v558_v62  ;;  %v1869_v62 = vld [vmem:[%s1969_s5] ss:$0 sm:$0xff]  ;;  %s1406_s5 = smov 16  }
 0x108   :  { %v401_v19 = vpop.f32.mrf.mxu0 }
 0x109   :  { %v564_v6 = vsub.f32 %v461_v57, %v563_v13  ;;  %v402_v11 = vadd.f32 %v401_v19, %v347_v61  ;;  %560 = vmatmul.f32.gmra.mxu2 %v559_v21  ;;  %701 = vmatmul.f32.gmra.mxu3 %v563_v13  ;;  %v452_v14 = vpop.f32.mrf.mxu1 }
 0x10b   :  { %v453_v18 = vadd.f32 %v452_v14, %v402_v11  ;;  %789 = vmatmul.f32.gmra.mxu0 %v564_v6  ;;  %v565_v15 = vand.u32 4294901760, %v564_v6 }
 0x10d   :  { %v462_v17 = vmax.f32 %v453_v18, 0.0  ;;  %869 = vmatmul.f32.gmra.mxu1 %v565_v15  ;;  %v566_v22 = vsub.f32 %v564_v6, %v565_v15 }
 0x10f   :  { %v571_v24 = vand.u32 4294901760, %v462_v17  ;;  %v567_v26 = vand.u32 4294901760, %v566_v22 }
 0x111   :  { %v572_v46 = vsub.f32 %v462_v17, %v571_v24  ;;  %568 = vmatmul.f32.gmra.mxu2 %v567_v26  ;;  %705 = vmatmul.f32.gmra.mxu3 %v571_v24 }
 0x113   :  { %794 = vmatmul.f32.gmra.mxu0 %v572_v46  ;;  %v573_v28 = vand.u32 4294901760, %v572_v46 }
 0x115   :  { %875 = vmatmul.f32.gmra.mxu1 %v573_v28  ;;  %v574_v29 = vsub.f32 %v572_v46, %v573_v28 }
 0x117   :  { %v575_v31 = vand.u32 4294901760, %v574_v29 }
 0x119   :  { %576 = vmatmul.f32.gmra.mxu2 %v575_v31  ;;  %1009 = vmatmul.f32.vlgmr.msra.gmra.mxu3 %v1795_v54 }
 0x121   :  { %944 = vmatmul.f32.vlgmr.msra.gmra.mxu2 %v1795_v54  ;;  %1013 = vmatmul.f32.gmra.mxu3 %v1803_v39 }
 0x129   :  { %948 = vmatmul.f32.gmra.mxu2 %v1803_v39  ;;  %1017 = vmatmul.f32.gmra.mxu3 %v1810_v30  ;;  %v1844_v39 = vld [vmem:[%s1968_s4] ss:$0 sm:$0xff] }
 0x131   :  { %952 = vmatmul.f32.gmra.mxu2 %v1810_v30  ;;  %1021 = vmatmul.f32.gmra.mxu3 %v1817_v34 }
 0x139   :  { %956 = vmatmul.f32.gmra.mxu2 %v1817_v34  ;;  %1025 = vmatmul.f32.gmra.mxu3 %v1824_v63 }
 0x141   :  { %960 = vmatmul.f32.gmra.mxu2 %v1824_v63  ;;  %1029 = vmatmul.f32.gmra.mxu3 %v555_v50 }
 0x149   :  { %964 = vmatmul.f32.gmra.mxu2 %v555_v50  ;;  %1033 = vmatmul.f32.gmra.mxu3 %v563_v13 }
 0x151   :  { %968 = vmatmul.f32.gmra.mxu2 %v563_v13  ;;  %1037 = vmatmul.f32.gmra.mxu3 %v571_v24 }
 0x158   :  { %v760_v58 = vpop.f32.mrf.mxu0 }
 0x159   :  { %972 = vmatmul.f32.gmra.mxu2 %v571_v24 }
 0x15a   :  { %v834_v59 = vpop.f32.mrf.mxu1 }
 0x15c   :  { %v678_v54 = vpop.f32.mrf.mxu3 }
 0x160   :  { %v765_v51 = vpop.f32.mrf.mxu0 }
 0x162   :  { %v840_v7 = vpop.f32.mrf.mxu1 }
 0x164   :  { %v521_v30 = vpop.f32.mrf.mxu2  ;;  %v682_v35 = vpop.f32.mrf.mxu3 }
 0x165   :  { %v522_v34 = vadd.f32 %v1844_v39, %v521_v30 }
 0x167   :  { %v679_v36 = vadd.f32 %v678_v54, %v522_v34 }
 0x168   :  { %v770_v56 = vpop.f32.mrf.mxu0 }
 0x169   :  { %v761_v10 = vadd.f32 %v760_v58, %v679_v36 }
 0x16a   :  { %v846_v16 = vpop.f32.mrf.mxu1 }
 0x16b   :  { %v835_v23 = vadd.f32 %v834_v59, %v761_v10 }
 0x16c   :  { %v529_v38 = vpop.f32.mrf.mxu2  ;;  %v686_v42 = vpop.f32.mrf.mxu3 }
 0x16d   :  { %v530_v5 = vadd.f32 %v1844_v39, %v529_v38 }
 0x16f   :  { %v683_v12 = vadd.f32 %v682_v35, %v530_v5 }
 0x170   :  { %v775_v20 = vpop.f32.mrf.mxu0 }
 0x171   :  { %v766_v52 = vadd.f32 %v765_v51, %v683_v12 }
 0x172   :  { %v852_v21 = vpop.f32.mrf.mxu1 }
 0x173   :  { %v841_v4 = vadd.f32 %v840_v7, %v766_v52 }
 0x174   :  { %v537_v43 = vpop.f32.mrf.mxu2  ;;  %v690_v33 = vpop.f32.mrf.mxu3 }
 0x175   :  { %v538_v44 = vadd.f32 %v1844_v39, %v537_v43 }
 0x177   :  { %v687_v3 = vadd.f32 %v686_v42, %v538_v44 }
 0x178   :  { %v780_v24 = vpop.f32.mrf.mxu0 }
 0x179   :  { %v771_v61 = vadd.f32 %v770_v56, %v687_v3 }
 0x17a   :  { %v858_v29 = vpop.f32.mrf.mxu1 }
 0x17b   :  { %v847_v6 = vadd.f32 %v846_v16, %v771_v61 }
 0x17c   :  { %v545_v45 = vpop.f32.mrf.mxu2  ;;  %v694_v48 = vpop.f32.mrf.mxu3 }
 0x17d   :  { %v546_v32 = vadd.f32 %v1844_v39, %v545_v45 }
 0x17f   :  { %v691_v19 = vadd.f32 %v690_v33, %v546_v32 }
 0x180   :  { %v785_v42 = vpop.f32.mrf.mxu0 }
 0x181   :  { %v776_v22 = vadd.f32 %v775_v20, %v691_v19 }
 0x183   :  { %v853_v28 = vadd.f32 %v852_v21, %v776_v22 }
 0x184   :  { %v553_v40 = vpop.f32.mrf.mxu2  ;;  %v698_v49 = vpop.f32.mrf.mxu3 }
 0x185   :  { %v554_v15 = vadd.f32 %v1844_v39, %v553_v40  ;;  %v864_v40 = vpop.f32.mrf.mxu1 }
 0x187   :  { %v695_v46 = vadd.f32 %v694_v48, %v554_v15 }
 0x188   :  { %v790_v10 = vpop.f32.mrf.mxu0 }
 0x189   :  { %v781_v34 = vadd.f32 %v780_v24, %v695_v46 }
 0x18b   :  { %v859_v33 = vadd.f32 %v858_v29, %v781_v34 }
 0x18c   :  { %v561_v2 = vpop.f32.mrf.mxu2  ;;  %v1847_v53 = vpop.f32.mrf.mxu3 }
 0x18d   :  { %v562_v30 = vadd.f32 %v1844_v39, %v561_v2 }
 0x18f   :  { %v699_v43 = vadd.f32 %v698_v49, %v562_v30 }
 0x191   :  { %v786_v51 = vadd.f32 %v785_v42, %v699_v43 }
 0x193   :  { %v865_v5 = vadd.f32 %v864_v40, %v786_v51 }
 0x194   :  { %v569_v60 = vpop.f32.mrf.mxu2  ;;  %v1849_v63 = vpop.f32.mrf.mxu3 }
 0x195   :  { %v570_v58 = vadd.f32 %v1844_v39, %v569_v60 }
 0x197   :  { %v703_v7 = vadd.f32 %v1847_v53, %v570_v58 }
 0x199   :  { %v791_v60 = vadd.f32 %v790_v10, %v703_v7 }
 0x19c   :  { %v1851_v0 = vpop.f32.mrf.mxu2  ;;  %v1010_v1 = vpop.f32.mrf.mxu3 }
 0x19d   :  { %v578_v12 = vadd.f32 %v1844_v39, %v1851_v0 }
 0x19f   :  { %v707_v44 = vadd.f32 %v1849_v63, %v578_v12 }
 0x1a4   :  { %v945_v25 = vpop.f32.mrf.mxu2  ;;  %v1014_v9 = vpop.f32.mrf.mxu3 }
 0x1a5   :  { %v946_v27 = vadd.f32 %v945_v25, %v835_v23  ;;  %v870_v25 = vpop.f32.mrf.mxu1 }
 0x1a6   :  { %v871_v53 = vadd.f32 %v870_v25, %v791_v60 }
 0x1a7   :  { %v1011_v50 = vadd.f32 %v1010_v1, %v946_v27 }
 0x1a9   :  { %v1861_v55 = vmul.f32 %v1857_v41, %v1011_v50  ;;  %v1043_v27 = vadd.f32 %v1869_v62, %v1011_v50 }
 0x1ac   :  { %v949_v37 = vpop.f32.mrf.mxu2  ;;  %v1018_v47 = vpop.f32.mrf.mxu3 }
 0x1ad   :  { %v950_v8 = vadd.f32 %v949_v37, %v841_v4  ;;  %v795_v4 = vpop.f32.mrf.mxu0 }
 0x1ae   :  { %v796_v39 = vadd.f32 %v795_v4, %v707_v44 }
 0x1af   :  { %v1864_v57 = vadd.f32 %v1014_v9, %v950_v8 }
 0x1b1   :  { %v1873_v13 = vadd.f32 %v1869_v62, %v1864_v57 }
 0x1b3   :  { %1053 = vmax.xlane.f32.xlu0 %v1873_v13 }
 0x1b4   :  { %v953_v11 = vpop.f32.mrf.mxu2  ;;  %v1022_v18 = vpop.f32.mrf.mxu3 }
 0x1b5   :  { %v954_v14 = vadd.f32 %v953_v11, %v847_v6 }
 0x1b7   :  { %v1877_v17 = vadd.f32 %v1018_v47, %v954_v14  ;;  %v876_v47 = vpop.f32.mrf.mxu1 }
 0x1b8   :  { %v877_v8 = vadd.f32 %v876_v47, %v796_v39 }
 0x1b9   :  { %v1881_v26 = vadd.f32 %v1869_v62, %v1877_v17 }
 0x1bb   :  { %1055 = vmax.xlane.f32.xlu0 %v1881_v26 }
 0x1bc   :  { %v957_v31 = vpop.f32.mrf.mxu2  ;;  %v1026_v36 = vpop.f32.mrf.mxu3 }
 0x1bd   :  { %v958_v54 = vadd.f32 %v957_v31, %v853_v28 }
 0x1bf   :  { %v1885_v35 = vadd.f32 %v1022_v18, %v958_v54 }
 0x1c1   :  { %v1046_v38 = vadd.f32 %v1869_v62, %v1885_v35 }
 0x1c3   :  { %1057 = vmax.xlane.f32.xlu1 %v1046_v38 }
 0x1c4   :  { %v961_v45 = vpop.f32.mrf.mxu2  ;;  %v1030_v1 = vpop.f32.mrf.mxu3 }
 0x1c5   :  { %v962_v48 = vadd.f32 %v961_v45, %v859_v33 }
 0x1c7   :  { %v1890_v59 = vadd.f32 %v1026_v36, %v962_v48 }
 0x1c9   :  { %v1047_v2 = vadd.f32 %v1869_v62, %v1890_v59 }
 0x1cb   :  { %1059 = vmax.xlane.f32.xlu1 %v1047_v2 }
 0x1cc   :  { %v965_v49 = vpop.f32.mrf.mxu2  ;;  %v1034_v52 = vpop.f32.mrf.mxu3 }
 0x1cd   :  { %v966_v56 = vadd.f32 %v965_v49, %v865_v5 }
 0x1cf   :  { %v1897_v23 = vadd.f32 %v1030_v1, %v966_v56 }
 0x1d1   :  { %v1048_v9 = vadd.f32 %v1869_v62, %v1897_v23 }
 0x1d3   :  { %1061 = vmax.xlane.f32.xlu2 %v1048_v9  ;;  %1051 = vmax.xlane.f32.xlu1 %v1043_v27 }
 0x1d4   :  { %v969_v16 = vpop.f32.mrf.mxu2  ;;  %v1038_v32 = vpop.f32.mrf.mxu3 }
 0x1d5   :  { %v970_v3 = vadd.f32 %v969_v16, %v871_v53 }
 0x1d7   :  { %v1903_v37 = vadd.f32 %v1034_v52, %v970_v3 }
 0x1d9   :  { %v1049_v0 = vadd.f32 %v1869_v62, %v1903_v37 }
 0x1db   :  { %1063 = vmax.xlane.f32.xlu2 %v1049_v0 }
 0x1dc   :  { %v973_v20 = vpop.f32.mrf.mxu2 }
 0x1dd   :  { %v974_v50 = vadd.f32 %v973_v20, %v877_v8 }
 0x1df   :  { %v1907_v63 = vadd.f32 %v1038_v32, %v974_v50 }
 0x1e1   :  { %v1050_v61 = vadd.f32 %v1869_v62, %v1907_v63 }
 0x1e3   :  { %1065 = vmax.xlane.f32.xlu0 %v1050_v61 }
 0x226   :  { %v1054_v21 = vpop.xlane.xlu0 %1053 }
 0x227   :  { %v1068_v19 = vsub.f32 %v1873_v13, %v1054_v21 }
 0x229   :  { %v1077_v6 = vmul.f32 1.442695, %v1068_v19 }
 0x22b   :  { %1319 = vpow2.f32 %v1077_v6 }
 0x22e   :  { %v1056_v11 = vpop.xlane.xlu0 %1055 }
 0x22f   :  { %v1069_v14 = vsub.f32 %v1881_v26, %v1056_v11 }
 0x231   :  { %v1913_v18 = vpop.eup %1319  ;;  %v1079_v15 = vmul.f32 1.442695, %v1069_v14 }
 0x232   :  { %1093 = vadd.xlane.f32.xlu2 %v1913_v18 }
 0x233   :  { %1321 = vpow2.f32 %v1079_v15 }
 0x236   :  { %v1058_v22 = vpop.xlane.xlu1 %1057 }
 0x237   :  { %v1070_v24 = vsub.f32 %v1046_v38, %v1058_v22 }
 0x239   :  { %v1916_v46 = vpop.eup %1321  ;;  %v1081_v62 = vmul.f32 1.442695, %v1070_v24 }
 0x23a   :  { %1095 = vadd.xlane.f32.xlu0 %v1916_v46 }
 0x23b   :  { %1323 = vpow2.f32 %v1081_v62 }
 0x23e   :  { %v1060_v13 = vpop.xlane.xlu1 %1059 }
 0x23f   :  { %v1071_v28 = vsub.f32 %v1047_v2, %v1060_v13 }
 0x241   :  { %v1919_v29 = vpop.eup %1323  ;;  %v1083_v31 = vmul.f32 1.442695, %v1071_v28 }
 0x242   :  { %1097 = vadd.xlane.f32.xlu1 %v1919_v29 }
 0x243   :  { %1325 = vpow2.f32 %v1083_v31 }
 0x246   :  { %v1062_v26 = vpop.xlane.xlu2 %1061  ;;  %v1052_v30 = vpop.xlane.xlu1 %1051 }
 0x247   :  { %v1072_v54 = vsub.f32 %v1048_v9, %v1062_v26  ;;  %v1067_v38 = vsub.f32 %v1043_v27, %v1052_v30 }
 0x249   :  { %v1922_v34 = vpop.eup %1325  ;;  %v1085_v36 = vmul.f32 1.442695, %v1072_v54  ;;  %v1075_v42 = vmul.f32 1.442695, %v1067_v38 }
 0x24a   :  { %1099 = vadd.xlane.f32.xlu2 %v1922_v34 }
 0x24b   :  { %1327 = vpow2.f32 %v1085_v36 }
 0x24c   :  { %1329 = vpow2.f32 %v1075_v42 }
 0x24e   :  { %v1064_v43 = vpop.xlane.xlu2 %1063 }
 0x24f   :  { %v1073_v33 = vsub.f32 %v1049_v0, %v1064_v43  ;;  %v1230_v0 = vmul.f32 %v1857_v41, %v1864_v57 }
 0x251   :  { %v1925_v45 = vpop.eup %1327  ;;  %v1087_v48 = vmul.f32 1.442695, %v1073_v33 }
 0x252   :  { %1101 = vadd.xlane.f32.xlu0 %v1925_v45  ;;  %v1928_v51 = vpop.eup %1329 }
 0x253   :  { %1331 = vpow2.f32 %v1087_v48 }
 0x256   :  { %v1066_v40 = vpop.xlane.xlu0 %1065 }
 0x257   :  { %v1074_v58 = vsub.f32 %v1050_v61, %v1066_v40 }
 0x259   :  { %v1930_v2 = vpop.eup %1331  ;;  %v1089_v1 = vmul.f32 1.442695, %v1074_v58 }
 0x25a   :  { %1103 = vadd.xlane.f32.xlu1 %v1930_v2  ;;  %1091 = vadd.xlane.f32.xlu0 %v1928_v51 }
 0x25b   :  { %1333 = vpow2.f32 %v1089_v1 }
 0x261   :  { %v1934_v7 = vpop.eup %1333 }
 0x262   :  { %1105 = vadd.xlane.f32.xlu2 %v1934_v7 }
 0x2a5   :  { %v1094_v5 = vpop.xlane.xlu2 %1093 }
 0x2a6   :  { %1335 = vrcp.f32 %v1094_v5  ;;  %v1133_v25 = vand.u32 2147483648, %v1094_v5  ;;  %v1131_v9 = vand.u32 2147483647, %v1094_v5  ;;  %vm1127_vm2 = vweird.f32 %v1094_v5 }
 0x2a8   :  { %v1134_v53 = vor.u32 1.1754944e-38, %v1133_v25  ;;  %vm1132_vm4 = vcmp.eq.f32.partialorder %v1131_v9, 8.507059e+37 }
 0x2ac   :  { %v1336_v10 = vpop.eup %1335 }
 0x2ad   :  { %v1123_v49 = vmul.f32 %v1336_v10, %v1094_v5  ;;  %v1096_v56 = vpop.xlane.xlu0 %1095  ;;  %vm1128_vm1 = vweird.f32 %v1336_v10 }
 0x2ae   :  { %1337 = vrcp.f32 %v1096_v56  ;;  %vm1129_vm3 = vmor %vm1127_vm2, %vm1128_vm1  ;;  %v1148_v20 = vand.u32 2147483648, %v1096_v56  ;;  %v1146_v50 = vand.u32 2147483647, %v1096_v56  ;;  %vm1142_vm6 = vweird.f32 %v1096_v56 }
 0x2af   :  { %v1124_v12 = vsub.f32 1.0, %v1123_v49 }
 0x2b0   :  { %v1149_v19 = vor.u32 1.1754944e-38, %v1148_v20  ;;  %vm1147_vm8 = vcmp.eq.f32.partialorder %v1146_v50, 8.507059e+37 }
 0x2b1   :  { %v1125_v60 = vmul.f32 %v1336_v10, %v1124_v12 }
 0x2b3   :  { %v1126_v27 = vadd.f32 %v1336_v10, %v1125_v60 }
 0x2b4   :  { %v1338_v44 = vpop.eup %1337 }
 0x2b5   :  { %v1138_v52 = vmul.f32 %v1338_v44, %v1096_v56  ;;  %v1098_v16 = vpop.xlane.xlu1 %1097  ;;  %v1130_v3 = vsel %vm1129_vm3, %v1336_v10, %v1126_v27  ;;  %vm1143_vm5 = vweird.f32 %v1338_v44 }
 0x2b6   :  { %1339 = vrcp.f32 %v1098_v16  ;;  %v1135_v39 = vsel %vm1132_vm4, %v1134_v53, %v1130_v3  ;;  %vm1144_vm7 = vmor %vm1142_vm6, %vm1143_vm5  ;;  %v1163_v62 = vand.u32 2147483648, %v1098_v16  ;;  %v1161_v13 = vand.u32 2147483647, %v1098_v16 }
 0x2b7   :  { %v1139_v4 = vsub.f32 1.0, %v1138_v52  ;;  %v1136_v47 = vmul.f32 %v1913_v18, %v1135_v39  ;;  %v1231_v18 = vmul.f32 %v1857_v41, %v1877_v17  ;;  %vm1157_vm10 = vweird.f32 %v1098_v16 }
 0x2b8   :  { %v1164_v54 = vor.u32 1.1754944e-38, %v1163_v62  ;;  %vm1162_vm12 = vcmp.eq.f32.partialorder %v1161_v13, 8.507059e+37 }
 0x2b9   :  { %v1140_v8 = vmul.f32 %v1338_v44, %v1139_v4  ;;  %v1238_v32 = vadd.f32 %v1230_v0, %v1136_v47  ;;  %v1234_v47 = vmul.f32 %v1857_v41, %v1897_v23 }
 0x2bb   :  { %v1141_v61 = vadd.f32 %v1338_v44, %v1140_v8  ;;  %1246 = vrot.lane.b32.xlu1 %v1238_v32, %s1406_s5 }
 0x2bc   :  { %v1340_v21 = vpop.eup %1339 }
 0x2bd   :  { %v1153_v6 = vmul.f32 %v1340_v21, %v1098_v16  ;;  %v1100_v11 = vpop.xlane.xlu2 %1099  ;;  %v1145_v14 = vsel %vm1144_vm7, %v1338_v44, %v1141_v61  ;;  %vm1158_vm9 = vweird.f32 %v1340_v21 }
 0x2be   :  { %1341 = vrcp.f32 %v1100_v11  ;;  %v1150_v15 = vsel %vm1147_vm8, %v1149_v19, %v1145_v14  ;;  %vm1159_vm11 = vmor %vm1157_vm10, %vm1158_vm9  ;;  %v1178_v48 = vand.u32 2147483648, %v1100_v11  ;;  %vm1172_vm14 = vweird.f32 %v1100_v11 }
 0x2bf   :  { %v1154_v57 = vsub.f32 1.0, %v1153_v6  ;;  %v1151_v22 = vmul.f32 %v1916_v46, %v1150_v15  ;;  %v1232_v46 = vmul.f32 %v1857_v41, %v1885_v35  ;;  %v1176_v1 = vand.u32 2147483647, %v1100_v11 }
 0x2c0   :  { %v1179_v12 = vor.u32 1.1754944e-38, %v1178_v48  ;;  %v1233_v35 = vmul.f32 %v1857_v41, %v1890_v59 }
 0x2c1   :  { %v1155_v24 = vmul.f32 %v1340_v21, %v1154_v57  ;;  %v1239_v28 = vadd.f32 %v1231_v18, %v1151_v22  ;;  %vm1177_vm1 = vcmp.eq.f32.partialorder %v1176_v1, 8.507059e+37 }
 0x2c3   :  { %v1156_v31 = vadd.f32 %v1340_v21, %v1155_v24  ;;  %1250 = vrot.lane.b32.xlu2 %v1239_v28, %s1407_s27 }
 0x2c4   :  { %v1342_v26 = vpop.eup %1341 }
 0x2c5   :  { %v1168_v30 = vmul.f32 %v1342_v26, %v1100_v11  ;;  %v1102_v36 = vpop.xlane.xlu0 %1101  ;;  %v1160_v38 = vsel %vm1159_vm11, %v1340_v21, %v1156_v31  ;;  %vm1173_vm13 = vweird.f32 %v1342_v26 }
 0x2c6   :  { %1343 = vrcp.f32 %v1102_v36  ;;  %v1165_v42 = vsel %vm1162_vm12, %v1164_v54, %v1160_v38  ;;  %vm1174_vm15 = vmor %vm1172_vm14, %vm1173_vm13  ;;  %v1193_v9 = vand.u32 2147483648, %v1102_v36  ;;  %v1191_v44 = vand.u32 2147483647, %v1102_v36 }
 0x2c7   :  { %v1169_v17 = vsub.f32 1.0, %v1168_v30  ;;  %v1166_v43 = vmul.f32 %v1919_v29, %v1165_v42  ;;  %vm1187_vm3 = vweird.f32 %v1102_v36  ;;  %v1236_v54 = vmul.f32 %v1857_v41, %v1907_v63 }
 0x2c8   :  { %v1194_v3 = vor.u32 1.1754944e-38, %v1193_v9  ;;  %vm1192_vm5 = vcmp.eq.f32.partialorder %v1191_v44, 8.507059e+37 }
 0x2c9   :  { %v1170_v33 = vmul.f32 %v1342_v26, %v1169_v17  ;;  %v1240_v40 = vadd.f32 %v1232_v46, %v1166_v43 }
 0x2cb   :  { %v1171_v58 = vadd.f32 %v1342_v26, %v1170_v33  ;;  %1254 = vrot.lane.b32.xlu0 %v1240_v40, %s1408_s28 }
 0x2cc   :  { %v1344_v5 = vpop.eup %1343 }
 0x2cd   :  { %v1183_v10 = vmul.f32 %v1344_v5, %v1102_v36  ;;  %v1104_v49 = vpop.xlane.xlu1 %1103  ;;  %v1175_v56 = vsel %vm1174_vm15, %v1342_v26, %v1171_v58  ;;  %vm1188_vm2 = vweird.f32 %v1344_v5 }
 0x2ce   :  { %1345 = vrcp.f32 %v1104_v49  ;;  %v1180_v29 = vsel %vm1177_vm1, %v1179_v12, %v1175_v56  ;;  %vm1189_vm4 = vmor %vm1187_vm3, %vm1188_vm2  ;;  %v1208_v20 = vand.u32 2147483648, %v1104_v49  ;;  %v1206_v32 = vand.u32 2147483647, %v1104_v49 }
 0x2cf   :  { %v1184_v60 = vsub.f32 1.0, %v1183_v10  ;;  %v1181_v27 = vmul.f32 %v1922_v34, %v1180_v29  ;;  %vm1202_vm7 = vweird.f32 %v1104_v49  ;;  %vm1274_vm3 = vcmask 261120  }
 0x2d0   :  { %v1209_v6 = vor.u32 1.1754944e-38, %v1208_v20  ;;  %vm1207_vm9 = vcmp.eq.f32.partialorder %v1206_v32, 8.507059e+37 }
 0x2d1   :  { %v1185_v25 = vmul.f32 %v1344_v5, %v1184_v60  ;;  %v1241_v52 = vadd.f32 %v1233_v35, %v1181_v27 }
 0x2d3   :  { %v1186_v53 = vadd.f32 %v1344_v5, %v1185_v25  ;;  %1258 = vrot.lane.b32.xlu2 %v1241_v52, %s1409_s29 }
 0x2d4   :  { %v1346_v16 = vpop.eup %1345 }
 0x2d5   :  { %v1106_v4 = vpop.xlane.xlu2 %1105  ;;  %v1190_v39 = vsel %vm1189_vm4, %v1344_v5, %v1186_v53  ;;  %v1198_v0 = vmul.f32 %v1346_v16, %v1104_v49  ;;  %vm1203_vm6 = vweird.f32 %v1346_v16  ;;  %vm1276_vm4 = vcmask 392192  }
 0x2d6   :  { %1347 = vrcp.f32 %v1106_v4  ;;  %v1195_v59 = vsel %vm1192_vm5, %v1194_v3, %v1190_v39  ;;  %vm1204_vm8 = vmor %vm1202_vm7, %vm1203_vm6  ;;  %v1223_v15 = vand.u32 2147483648, %v1106_v4  ;;  %v1221_v24 = vand.u32 2147483647, %v1106_v4 }
 0x2d7   :  { %v1199_v8 = vsub.f32 1.0, %v1198_v0  ;;  %v1196_v34 = vmul.f32 %v1925_v45, %v1195_v59  ;;  %v1235_v45 = vmul.f32 %v1857_v41, %v1903_v37  ;;  %vm1217_vm11 = vweird.f32 %v1106_v4 }
 0x2d8   :  { %v1224_v28 = vor.u32 1.1754944e-38, %v1223_v15  ;;  %vm1222_vm13 = vcmp.eq.f32.partialorder %v1221_v24, 8.507059e+37  ;;  %vm1278_vm5 = vcmask 523264   ;;  %vm1280_vm6 = vcmask 654336  }
 0x2d9   :  { %v1200_v50 = vmul.f32 %v1346_v16, %v1199_v8  ;;  %v1242_v61 = vadd.f32 %v1234_v47, %v1196_v34  ;;  %vm1282_vm7 = vcmask 785408  }
 0x2db   :  { %v1201_v19 = vadd.f32 %v1346_v16, %v1200_v50  ;;  %1262 = vrot.lane.b32.xlu1 %v1242_v61, %s1410_s30 }
 0x2dc   :  { %v1348_v21 = vpop.eup %1347 }
 0x2dd   :  { %v1213_v11 = vmul.f32 %v1348_v21, %v1106_v4  ;;  %v1205_v14 = vsel %vm1204_vm8, %v1346_v16, %v1201_v19  ;;  %vm1218_vm10 = vweird.f32 %v1348_v21  ;;  %vm1284_vm8 = vcmask 916480  }
 0x2de   :  { %v1210_v23 = vsel %vm1207_vm9, %v1209_v6, %v1205_v14  ;;  %vm1219_vm12 = vmor %vm1217_vm11, %vm1218_vm10 }
 0x2df   :  { %v1214_v57 = vsub.f32 1.0, %v1213_v11  ;;  %v1211_v18 = vmul.f32 %v1930_v2, %v1210_v23  ;;  %v1092_v2 = vpop.xlane.xlu0 %1091 }
 0x2e0   :  { %1349 = vrcp.f32 %v1092_v2  ;;  %v1118_v43 = vand.u32 2147483648, %v1092_v2  ;;  %vm1112_vm15 = vweird.f32 %v1092_v2  ;;  %v1116_v33 = vand.u32 2147483647, %v1092_v2 }
 0x2e1   :  { %v1215_v22 = vmul.f32 %v1348_v21, %v1214_v57  ;;  %v1243_v62 = vadd.f32 %v1235_v45, %v1211_v18 }
 0x2e2   :  { %v1119_v40 = vor.u32 1.1754944e-38, %v1118_v43  ;;  %vm1117_vm2 = vcmp.eq.f32.partialorder %v1116_v33, 8.507059e+37 }
 0x2e3   :  { %v1216_v13 = vadd.f32 %v1348_v21, %v1215_v22  ;;  %1266 = vrot.lane.b32.xlu0 %v1243_v62, %s1411_s7 }
 0x2e5   :  { %v1220_v31 = vsel %vm1219_vm12, %v1348_v21, %v1216_v13 }
 0x2e6   :  { %v1225_v26 = vsel %vm1222_vm13, %v1224_v28, %v1220_v31  ;;  %v1350_v36 = vpop.eup %1349 }
 0x2e7   :  { %v1226_v37 = vmul.f32 %v1934_v7, %v1225_v26  ;;  %v1108_v38 = vmul.f32 %v1350_v36, %v1092_v2  ;;  %vm1113_vm14 = vweird.f32 %v1350_v36 }
 0x2e8   :  { %vm1114_vm1 = vmor %vm1112_vm15, %vm1113_vm14 }
 0x2e9   :  { %v1244_v30 = vadd.f32 %v1236_v54, %v1226_v37  ;;  %v1109_v17 = vsub.f32 1.0, %v1108_v38 }
 0x2eb   :  { %1270 = vrot.lane.b32.xlu2 %v1244_v30, %s1412_s8  ;;  %v1110_v42 = vmul.f32 %v1350_v36, %v1109_v17 }
 0x2ed   :  { %v1111_v46 = vadd.f32 %v1350_v36, %v1110_v42 }
 0x2ef   :  { %v1115_v48 = vsel %vm1114_vm1, %v1350_v36, %v1111_v46 }
 0x2f0   :  { %v1120_v41 = vsel %vm1117_vm2, %v1119_v40, %v1115_v48 }
 0x2f1   :  { %v1121_v7 = vmul.f32 %v1928_v51, %v1120_v41 }
 0x2f3   :  { %v1237_v1 = vadd.f32 %v1861_v55, %v1121_v7 }
 0x31d   :  { %v1251_v63 = vpop.permute.xlu2 %1250 }
 0x32d   :  { %v1247_v58 = vpop.permute.xlu1 %1246  ;;  %v1259_v49 = vpop.permute.xlu2 %1258 }
 0x32e   :  { %v1273_v5 = vsel %vm54_vm0, %v1237_v1, %v1247_v58 }
 0x32f   :  { %v1275_v56 = vsel %vm1274_vm3, %v1273_v5, %v1251_v63 }
 0x33d   :  { %v1255_v10 = vpop.permute.xlu0 %1254 }
 0x33e   :  { %v1277_v12 = vsel %vm1276_vm4, %v1275_v56, %v1255_v10 }
 0x33f   :  { %v1279_v51 = vsel %vm1278_vm5, %v1277_v12, %v1259_v49 }
 0x345   :  { %v1271_v29 = vpop.permute.xlu2 %1270 }
 0x34d   :  { %v1263_v60 = vpop.permute.xlu1 %1262 }
 0x34e   :  { %v1281_v55 = vsel %vm1280_vm6, %v1279_v51, %v1263_v60 }
 0x355   :  { %v1267_v35 = vpop.permute.xlu0 %1266 }
 0x356   :  { %v1283_v25 = vsel %vm1282_vm7, %v1281_v55, %v1267_v35 }
 0x357   :  { %v1285_v9 = vsel %vm1284_vm8, %v1283_v25, %v1271_v29 }
 0x358   :  { %1286 = vst [vmem:[#allocation5] sm:$0xff] %v1285_v9 }
 0x359   :  { %1297 = dma.vmem_to_hbm [thread:$0]  %s1293_s9, 128, %s1295_s12, [#allocation4]  }
 0x35a   :  { %1401 = dma.done.wait [#allocation4], 128  }
 0x35b   :  { %1402 = vsyncadd [#allocation4], 4294967168 }
 0x35c   :  { %1302 = vsyncpa [#allocation3], 1 }
 0x35d   :  { %1303 = vsyncpa [#allocation4], 1 }

</bundles_post_ra>
